<compile_context>
chip_gen: v7x
topology: tpu7x:2x2x1
jax: 0.10.0
libtpu: 0.0.40
codegen_flags: <defaults>
</compile_context>

<pallas_src>
import numpy as np
import jax
import jax.numpy as jnp
from jax import lax
from jax.experimental import pallas as pl
from jax.experimental.pallas import tpu as pltpu

CHANNELS = 5          # EEG channels ("height" axis, untouched by all convs)
FREQ_BANDS = 7        # frequency bands ("width" axis)
LATENT_DIM = 64
C1, C2 = 16, 32       # encoder conv channel counts
F32 = jnp.float32
BF16 = jnp.bfloat16

# lane widths of the packed slabs (parity slabs padded to 128-lane multiples)
IN_W = CHANNELS * FREQ_BANDS         # 35 : h*7 + w                 (input)
P1SLAB = 256                         # conv1 parity slab: 240 real + 16 zero pad
CONV1_W = 2 * P1SLAB                 # 512: parity*256 + pair*80 + h*16 + c
POOL1_W = P1SLAB                     # 256 (conv2 contraction K)
P2SLAB = 256                         # conv2 parity slab: 160 real + 96 zero pad
CONV2_W = 2 * P2SLAB                 # 512: parity*256 + h*32 + c
POOL2_W = P2SLAB                     # 256 (fc1 / folded-decoder contraction K)
DEC1_W = CHANNELS * 2 * C1           # 160: h*32 + ow*16 + co       (deconv1 out)
REC_W = CHANNELS * FREQ_BANDS        # 35 : h*7 + ow2               (reconstruction)
REC_PAD = 64                         # recon padded to 64 lanes inside the kernel
OUT_SLAB = LATENT_DIM + REC_PAD      # 128-lane merged output slab


# ------------------------------ fused Pallas kernel ------------------------------

def _fused_kernel(x_ref, w1_ref, b1_ref, w2_ref, b2_ref, wf1_ref, bf1_ref,
                  wfd_ref, bfd_ref, wd2_ref, bd2_ref, out_ref):
    x = x_ref[...]                                                   # (TB, 35) bf16

    # Conv2d(1->16,(1,3),pad(0,1)) + ReLU as one Toeplitz matmul.  Width 6 is
    # dropped by the floor-mode MaxPool and never computed; outputs are
    # parity-major so the pool is a max of two 128-aligned 256-lane slabs.
    c1 = jnp.maximum(
        jnp.dot(x, w1_ref[...], preferred_element_type=F32) + b1_ref[...], 0.0)
    p1 = jnp.maximum(c1[:, :POOL1_W], c1[:, POOL1_W:])               # (TB, 256) f32

    # Conv2d(16->32,(1,3),pad(0,1)) + ReLU as one block-banded matmul
    # (pooled width 2 dropped by the next floor-mode pool).
    c2 = jnp.maximum(
        jnp.dot(p1.astype(BF16), w2_ref[...], preferred_element_type=F32)
        + b2_ref[...], 0.0)
    p2 = jnp.maximum(c2[:, :POOL2_W], c2[:, POOL2_W:]).astype(BF16)  # (TB, 256)

    # fc1 -> latent (flatten permutation baked into wf1 by pack_params)
    lat = jnp.dot(p2, wf1_ref[...], preferred_element_type=F32) + bf1_ref[...]

    # fc1 + fc2 + ConvTranspose2d(32->16,(1,2),s=(1,2),out_pad(0,1)) + ReLU,
    # algebraically folded into one (256,160) matmul straight from p2.
    r1 = jnp.maximum(
        jnp.dot(p2, wfd_ref[...], preferred_element_type=F32) + bfd_ref[...], 0.0)

    # ConvTranspose2d(16->1,(1,2),s=(1,2),out_pad(0,1)) + Sigmoid as one matmul
    # (the deconv1 output-padding / bias-only column is folded into bd2).
    y = (jnp.dot(r1.astype(BF16), wd2_ref[...], preferred_element_type=F32)
         + bd2_ref[...])                                             # (TB, 64)
    y = pl.reciprocal(1.0 + jnp.exp(-y), approx=True)

    # Single lane-dense 128-wide store: lanes [0,64)=latent, [64,99)=recon.
    out_ref[...] = jnp.concatenate([lat, y], axis=-1)                # (TB, 128)


# ------------------------------ wrapper / glue ------------------------------

def eeg_autoencoder_forward(x, params, block_b=2048):
    """x: (B, CHANNELS, FREQ_BANDS) f32 -> (recon (B,5,7), latent (B,latent))."""
    assert block_b % 8 == 0, "block_b must be a multiple of 8 (sublane rule)"
    B = x.shape[0]
    ld = params["wf1"].shape[1]
    slab = ld + REC_PAD

    if B > block_b:
        TB = block_b
    elif B >= 16:
        # split into >=2 grid steps so both v7x TensorCores get work
        TB = min(block_b, ((-(-B // 2) + 7) // 8) * 8)
    else:
        TB = B                                   # block == full dim, always legal
    Bp = ((B + TB - 1) // TB) * TB

    x2 = x.reshape(B, IN_W).astype(BF16)          # bf16 input slab: half the DMA
    if Bp != B:
        x2 = jnp.pad(x2, ((0, Bp - B), (0, 0)))

    weights = (params["w1"], params["b1"], params["w2"], params["b2"],
               params["wf1"], params["bf1"], params["wfd"], params["bfd"],
               params["wd2"], params["bd2"])

    out = pl.pallas_call(
        _fused_kernel,
        grid=(Bp // TB,),
        in_specs=[pl.BlockSpec((TB, IN_W), lambda i: (i, 0))] +
                 [pl.BlockSpec(w.shape, lambda i: (0, 0)) for w in weights],
        out_specs=pl.BlockSpec((TB, slab), lambda i: (i, 0)),
        out_shape=jax.ShapeDtypeStruct((Bp, slab), F32),
        compiler_params=pltpu.CompilerParams(
            dimension_semantics=("parallel",),
            vmem_limit_bytes=48 * 1024 * 1024),
    )(x2, *weights)

    latent = out[:B, :ld]
    recon = out[:B, ld:ld + REC_W].reshape(B, CHANNELS, FREQ_BANDS)
    return recon, latent


# ------------------------- parameters (deterministic) ------------------------

def init_raw_params(key):
    """Raw PyTorch-shaped parameters, deterministic uniform init."""
    n_feat = C2 * CHANNELS * (FREQ_BANDS // 4)       # 160
    ks = jax.random.split(key, 12)

    def u(k, shape, fan_in):
        b = 1.0 / np.sqrt(fan_in)
        return jax.random.uniform(k, shape, F32, -b, b)

    return (u(ks[0], (C1, 1, 1, 3), 3),       u(ks[1], (C1,), 3),            # conv1
            u(ks[2], (C2, C1, 1, 3), 48),     u(ks[3], (C2,), 48),           # conv2
            u(ks[4], (LATENT_DIM, n_feat), n_feat), u(ks[5], (LATENT_DIM,), n_feat),
            u(ks[6], (n_feat, LATENT_DIM), LATENT_DIM), u(ks[7], (n_feat,), LATENT_DIM),
            u(ks[8], (C2, C1, 1, 2), 32),     u(ks[9], (C1,), 32),           # deconv1
            u(ks[10], (C1, 1, 1, 2), 16),     u(ks[11], (1,), 16))           # deconv2


def pack_params(raw):
    """Pre-pack PyTorch-layout weights into the fused kernel's matmul weights."""
    (c1w, c1b, c2w, c2b, f1w, f1b, f2w, f2b, d1w, d1b, d2w, d2b) = [
        np.asarray(a, np.float32) for a in raw]
    H, Wd = CHANNELS, FREQ_BANDS
    ld = f1w.shape[0]

    # conv1 as Toeplitz matmul (35 -> 512), parity-major, 128-aligned slabs.
    W1 = np.zeros((IN_W, CONV1_W), np.float32)
    B1 = np.zeros((1, CONV1_W), np.float32)
    for h in range(H):
        for w_out in range(6):                       # width 6 dropped by floor pool
            parity, pair = w_out % 2, w_out // 2
            j0 = parity * P1SLAB + pair * (H * C1) + h * C1
            B1[0, j0:j0 + C1] = c1b
            for t in range(3):
                w_in = w_out + t - 1
                if 0 <= w_in < Wd:
                    W1[h * Wd + w_in, j0:j0 + C1] += c1w[:, 0, 0, t]

    # conv2 as block-banded matmul (256 -> 512), output widths 0,1 only.
    W2 = np.zeros((POOL1_W, CONV2_W), np.float32)
    B2 = np.zeros((1, CONV2_W), np.float32)
    for h in range(H):
        for w_out in range(2):                       # width 2 dropped by floor pool
            for co in range(C2):
                j = w_out * P2SLAB + h * C2 + co
                B2[0, j] = c2b[co]
                for t in range(3):
                    w_in = w_out + t - 1
                    if 0 <= w_in < 3:
                        i0 = w_in * (H * C1) + h * C1
                        W2[i0:i0 + C1, j] += c2w[co, :, 0, t]

    # fc1: permute PyTorch flatten order (c*5 + h) -> kernel order (h*32 + c),
    # embedded in a 256-row (128-aligned) matrix (pad rows are zero).
    perm = (np.arange(C2)[None, :] * H + np.arange(H)[:, None]).reshape(-1)
    WF1 = np.zeros((POOL2_W, ld), np.float32)
    WF1[:H * C2, :] = f1w[:, perm].T
    BF1 = f1b[None, :]

    # fc2 folded with deconv1 (kernel (1,2), stride (1,2), out_pad (0,1)).
    WD = np.zeros((ld, DEC1_W), np.float32)
    BD = np.zeros((1, DEC1_W), np.float32)
    for h in range(H):
        f2w_h = f2w[np.arange(C2) * H + h, :]        # (32, ld)
        f2b_h = f2b[np.arange(C2) * H + h]           # (32,)
        for ow in range(2):
            j0 = h * (2 * C1) + ow * C1
            WD[:, j0:j0 + C1] = f2w_h.T @ d1w[:, :, 0, ow]
            BD[0, j0:j0 + C1] = f2b_h @ d1w[:, :, 0, ow] + d1b

    # fc1 folded into fc2*deconv1 (exact: no nonlinearity between fc1 and fc2).
    WFD = WF1 @ WD                                   # (256, 160)
    BFD = BF1 @ WD + BD                              # (1, 160)

    # deconv2 (kernel (1,2), stride (1,2), out_pad (0,1)) as matmul 160 -> 64
    # (cols 0..34 are the reconstruction, cols 35..63 are zero padding).
    WD2 = np.zeros((DEC1_W, REC_PAD), np.float32)
    BD2 = np.zeros((1, REC_PAD), np.float32)
    BD2[0, :REC_W] = d2b[0]
    relu_d1b = np.maximum(d1b, 0.0)
    for h in range(H):
        for ow in range(2):
            for k in range(2):
                i0 = h * (2 * C1) + ow * C1
                WD2[i0:i0 + C1, h * Wd + 2 * ow + k] = d2w[:, 0, 0, k]
        for k in range(2):   # deconv1 output-padding column -> recon widths 4,5
            BD2[0, h * Wd + 4 + k] += float(relu_d1b @ d2w[:, 0, 0, k])

    return dict(
        w1=jnp.asarray(W1, BF16), b1=jnp.asarray(B1, F32),
        w2=jnp.asarray(W2, BF16), b2=jnp.asarray(B2, F32),
        wf1=jnp.asarray(WF1, BF16), bf1=jnp.asarray(BF1, F32),
        wfd=jnp.asarray(WFD, BF16), bfd=jnp.asarray(BFD, F32),
        wd2=jnp.asarray(WD2, BF16), bd2=jnp.asarray(BD2, F32))


# --------------------------- plain-JAX reference ----------------------------

def ref_forward(x, raw):
    (c1w, c1b, c2w, c2b, f1w, f1b, f2w, f2b, d1w, d1b, d2w, d2b) = raw
    B = x.shape[0]
    dn = ("NCHW", "OIHW", "NCHW")
    hp = lax.Precision.HIGHEST
    h = x[:, None, :, :]
    h = lax.conv_general_dilated(h, c1w, (1, 1), ((0, 0), (1, 1)),
                                 dimension_numbers=dn, precision=hp)
    h = jnp.maximum(h + c1b[None, :, None, None], 0.0)
    h = lax.reduce_window(h, -np.inf, lax.max, (1, 1, 1, 2), (1, 1, 1, 2), "VALID")
    h = lax.conv_general_dilated(h, c2w, (1, 1), ((0, 0), (1, 1)),
                                 dimension_numbers=dn, precision=hp)
    h = jnp.maximum(h + c2b[None, :, None, None], 0.0)
    h = lax.reduce_window(h, -np.inf, lax.max, (1, 1, 1, 2), (1, 1, 1, 2), "VALID")
    flat = h.reshape(B, -1)
    latent = jnp.dot(flat, f1w.T, precision=hp) + f1b
    z = jnp.dot(latent, f2w.T, precision=hp) + f2b
    z = z.reshape(B, 32, CHANNELS, 1)
    # ConvTranspose == conv with lhs_dilation, IO-transposed & spatially flipped kernel
    w = jnp.transpose(d1w, (1, 0, 2, 3))[:, :, :, ::-1]
    z = lax.conv_general_dilated(z, w, (1, 1), ((0, 0), (1, 2)),
                                 lhs_dilation=(1, 2), dimension_numbers=dn,
                                 precision=hp)
    z = jnp.maximum(z + d1b[None, :, None, None], 0.0)
    w = jnp.transpose(d2w, (1, 0, 2, 3))[:, :, :, ::-1]
    z = lax.conv_general_dilated(z, w, (1, 1), ((0, 0), (1, 2)),
                                 lhs_dilation=(1, 2), dimension_numbers=dn,
                                 precision=hp)
    z = jax.nn.sigmoid(z + d2b[None, :, None, None])
    return z[:, 0, :, :], latent


# ----------------------------------- main ------------------------------------

if __name__ == "__main__":
    key = jax.random.PRNGKey(0)
    kx, kp = jax.random.split(key)

    raw = init_raw_params(kp)
    params = pack_params(raw)

    # B=2 exercises the single-block path; B=40 the padded multi-step grid path.
    for B in (2, 40):
        x = jax.random.uniform(jax.random.fold_in(kx, B),
                               (B, CHANNELS, FREQ_BANDS), F32)
        out, latent = eeg_autoencoder_forward(x, params)
        out = jax.block_until_ready(out)
        latent = jax.block_until_ready(latent)

        ref_out, ref_latent = ref_forward(x, raw)
        # bf16 matmuls (f32 accumulation) vs. the f32 reference -> looser tol.
        np.testing.assert_allclose(np.asarray(out), np.asarray(ref_out),
                                   rtol=2e-2, atol=2e-2)
        np.testing.assert_allclose(np.asarray(latent), np.asarray(ref_latent),
                                   rtol=2e-2, atol=2e-2)
        assert out.shape == (B, CHANNELS, FREQ_BANDS)
        assert latent.shape == (B, LATENT_DIM)

    print("KERNEL_OK")
</pallas_src>

<mosaic_0001>
module attributes {stable_mosaic.version = 11 : i64} {
  func.func @_fused_kernel(%arg0: i32, %arg1: memref<2x35xbf16, #tpu.memory_space<vmem>>, %arg2: memref<35x512xbf16, #tpu.memory_space<vmem>>, %arg3: memref<1x512xf32, #tpu.memory_space<vmem>>, %arg4: memref<256x512xbf16, #tpu.memory_space<vmem>>, %arg5: memref<1x512xf32, #tpu.memory_space<vmem>>, %arg6: memref<256x64xbf16, #tpu.memory_space<vmem>>, %arg7: memref<1x64xf32, #tpu.memory_space<vmem>>, %arg8: memref<256x160xbf16, #tpu.memory_space<vmem>>, %arg9: memref<1x160xf32, #tpu.memory_space<vmem>>, %arg10: memref<160x64xbf16, #tpu.memory_space<vmem>>, %arg11: memref<1x64xf32, #tpu.memory_space<vmem>>, %arg12: memref<2x128xf32, #tpu.memory_space<vmem>>) attributes {dimension_semantics = [#tpu.dimension_semantics<parallel>], iteration_bounds = array<i64: 1>, scalar_prefetch = 0 : i64, scratch_operands = 0 : i64, tpu.core_type = #tpu.core_type<tc>, window_params = [{transform_indices = @transform_0, window_bounds = array<i64: 2, 35>}, {pipeline_mode = #tpu.pipeline_mode<synchronous>, transform_indices = @transform_1, window_bounds = array<i64: 35, 512>}, {pipeline_mode = #tpu.pipeline_mode<synchronous>, transform_indices = @transform_2, window_bounds = array<i64: 1, 512>}, {pipeline_mode = #tpu.pipeline_mode<synchronous>, transform_indices = @transform_3, window_bounds = array<i64: 256, 512>}, {pipeline_mode = #tpu.pipeline_mode<synchronous>, transform_indices = @transform_4, window_bounds = array<i64: 1, 512>}, {pipeline_mode = #tpu.pipeline_mode<synchronous>, transform_indices = @transform_5, window_bounds = array<i64: 256, 64>}, {pipeline_mode = #tpu.pipeline_mode<synchronous>, transform_indices = @transform_6, window_bounds = array<i64: 1, 64>}, {pipeline_mode = #tpu.pipeline_mode<synchronous>, transform_indices = @transform_7, window_bounds = array<i64: 256, 160>}, {pipeline_mode = #tpu.pipeline_mode<synchronous>, transform_indices = @transform_8, window_bounds = array<i64: 1, 160>}, {pipeline_mode = #tpu.pipeline_mode<synchronous>, transform_indices = @transform_9, window_bounds = array<i64: 160, 64>}, {pipeline_mode = #tpu.pipeline_mode<synchronous>, transform_indices = @transform_10, window_bounds = array<i64: 1, 64>}, {transform_indices = @transform_11, window_bounds = array<i64: 2, 128>}]} {
    %c0 = arith.constant 0 : index
    %c0_0 = arith.constant 0 : index
    %0 = vector.load %arg1[%c0, %c0_0] : memref<2x35xbf16, #tpu.memory_space<vmem>>, vector<2x35xbf16>
    %c0_1 = arith.constant 0 : index
    %c0_2 = arith.constant 0 : index
    %1 = vector.load %arg2[%c0_1, %c0_2] : memref<35x512xbf16, #tpu.memory_space<vmem>>, vector<35x512xbf16>
    %cst = arith.constant dense<0.000000e+00> : vector<2x512xf32>
    %2 = tpu.matmul %0, %1, %cst {dimension_numbers = #tpu.dot_dimension_numbers<[1], [0], [0], [1], [0, 0, 1, 1], [], []>} : vector<2x35xbf16>, vector<35x512xbf16>, vector<2x512xf32> -> vector<2x512xf32>
    %c0_3 = arith.constant 0 : index
    %c0_4 = arith.constant 0 : index
    %3 = vector.load %arg3[%c0_3, %c0_4] : memref<1x512xf32, #tpu.memory_space<vmem>>, vector<1x512xf32>
    %4 = vector.broadcast %3 : vector<1x512xf32> to vector<2x512xf32>
    %5 = arith.addf %2, %4 : vector<2x512xf32>
    %cst_5 = arith.constant 0.000000e+00 : f32
    %6 = vector.broadcast %cst_5 : f32 to vector<2x512xf32>
    %7 = arith.maximumf %5, %6 : vector<2x512xf32>
    %8 = vector.extract_strided_slice %7 {offsets = [0, 0], sizes = [2, 256], strides = [1, 1]} : vector<2x512xf32> to vector<2x256xf32>
    %9 = vector.extract_strided_slice %7 {offsets = [0, 256], sizes = [2, 256], strides = [1, 1]} : vector<2x512xf32> to vector<2x256xf32>
    %10 = arith.maximumf %8, %9 : vector<2x256xf32>
    %11 = arith.truncf %10 : vector<2x256xf32> to vector<2x256xbf16>
    %c0_6 = arith.constant 0 : index
    %c0_7 = arith.constant 0 : index
    %12 = vector.load %arg4[%c0_6, %c0_7] : memref<256x512xbf16, #tpu.memory_space<vmem>>, vector<256x512xbf16>
    %cst_8 = arith.constant dense<0.000000e+00> : vector<2x512xf32>
    %13 = tpu.matmul %11, %12, %cst_8 {dimension_numbers = #tpu.dot_dimension_numbers<[1], [0], [0], [1], [0, 0, 1, 1], [], []>} : vector<2x256xbf16>, vector<256x512xbf16>, vector<2x512xf32> -> vector<2x512xf32>
    %c0_9 = arith.constant 0 : index
    %c0_10 = arith.constant 0 : index
    %14 = vector.load %arg5[%c0_9, %c0_10] : memref<1x512xf32, #tpu.memory_space<vmem>>, vector<1x512xf32>
    %15 = vector.broadcast %14 : vector<1x512xf32> to vector<2x512xf32>
    %16 = arith.addf %13, %15 : vector<2x512xf32>
    %cst_11 = arith.constant 0.000000e+00 : f32
    %17 = vector.broadcast %cst_11 : f32 to vector<2x512xf32>
    %18 = arith.maximumf %16, %17 : vector<2x512xf32>
    %19 = vector.extract_strided_slice %18 {offsets = [0, 0], sizes = [2, 256], strides = [1, 1]} : vector<2x512xf32> to vector<2x256xf32>
    %20 = vector.extract_strided_slice %18 {offsets = [0, 256], sizes = [2, 256], strides = [1, 1]} : vector<2x512xf32> to vector<2x256xf32>
    %21 = arith.maximumf %19, %20 : vector<2x256xf32>
    %22 = arith.truncf %21 : vector<2x256xf32> to vector<2x256xbf16>
    %c0_12 = arith.constant 0 : index
    %c0_13 = arith.constant 0 : index
    %23 = vector.load %arg6[%c0_12, %c0_13] : memref<256x64xbf16, #tpu.memory_space<vmem>>, vector<256x64xbf16>
    %cst_14 = arith.constant dense<0.000000e+00> : vector<2x64xf32>
    %24 = tpu.matmul %22, %23, %cst_14 {dimension_numbers = #tpu.dot_dimension_numbers<[1], [0], [0], [1], [0, 0, 1, 1], [], []>} : vector<2x256xbf16>, vector<256x64xbf16>, vector<2x64xf32> -> vector<2x64xf32>
    %c0_15 = arith.constant 0 : index
    %c0_16 = arith.constant 0 : index
    %25 = vector.load %arg7[%c0_15, %c0_16] : memref<1x64xf32, #tpu.memory_space<vmem>>, vector<1x64xf32>
    %26 = vector.broadcast %25 : vector<1x64xf32> to vector<2x64xf32>
    %27 = arith.addf %24, %26 : vector<2x64xf32>
    %c0_17 = arith.constant 0 : index
    %c0_18 = arith.constant 0 : index
    %28 = vector.load %arg8[%c0_17, %c0_18] : memref<256x160xbf16, #tpu.memory_space<vmem>>, vector<256x160xbf16>
    %cst_19 = arith.constant dense<0.000000e+00> : vector<2x160xf32>
    %29 = tpu.matmul %22, %28, %cst_19 {dimension_numbers = #tpu.dot_dimension_numbers<[1], [0], [0], [1], [0, 0, 1, 1], [], []>} : vector<2x256xbf16>, vector<256x160xbf16>, vector<2x160xf32> -> vector<2x160xf32>
    %c0_20 = arith.constant 0 : index
    %c0_21 = arith.constant 0 : index
    %30 = vector.load %arg9[%c0_20, %c0_21] : memref<1x160xf32, #tpu.memory_space<vmem>>, vector<1x160xf32>
    %31 = vector.broadcast %30 : vector<1x160xf32> to vector<2x160xf32>
    %32 = arith.addf %29, %31 : vector<2x160xf32>
    %cst_22 = arith.constant 0.000000e+00 : f32
    %33 = vector.broadcast %cst_22 : f32 to vector<2x160xf32>
    %34 = arith.maximumf %32, %33 : vector<2x160xf32>
    %35 = arith.truncf %34 : vector<2x160xf32> to vector<2x160xbf16>
    %c0_23 = arith.constant 0 : index
    %c0_24 = arith.constant 0 : index
    %36 = vector.load %arg10[%c0_23, %c0_24] : memref<160x64xbf16, #tpu.memory_space<vmem>>, vector<160x64xbf16>
    %cst_25 = arith.constant dense<0.000000e+00> : vector<2x64xf32>
    %37 = tpu.matmul %35, %36, %cst_25 {dimension_numbers = #tpu.dot_dimension_numbers<[1], [0], [0], [1], [0, 0, 1, 1], [], []>} : vector<2x160xbf16>, vector<160x64xbf16>, vector<2x64xf32> -> vector<2x64xf32>
    %c0_26 = arith.constant 0 : index
    %c0_27 = arith.constant 0 : index
    %38 = vector.load %arg11[%c0_26, %c0_27] : memref<1x64xf32, #tpu.memory_space<vmem>>, vector<1x64xf32>
    %39 = vector.broadcast %38 : vector<1x64xf32> to vector<2x64xf32>
    %40 = arith.addf %37, %39 : vector<2x64xf32>
    %cst_28 = arith.constant 0.000000e+00 : f32
    %41 = vector.broadcast %cst_28 : f32 to vector<2x64xf32>
    %42 = arith.subf %41, %40 : vector<2x64xf32>
    %43 = math.exp %42 : vector<2x64xf32>
    %cst_29 = arith.constant 1.000000e+00 : f32
    %44 = vector.broadcast %cst_29 : f32 to vector<2x64xf32>
    %45 = arith.addf %44, %43 : vector<2x64xf32>
    %46 = tpu.reciprocal %45 {approx = true} : vector<2x64xf32> -> vector<2x64xf32>
    %47 = tpu.concatenate %27, %46 in 1 : vector<2x64xf32>, vector<2x64xf32> -> vector<2x128xf32>
    %c0_30 = arith.constant 0 : index
    %c0_31 = arith.constant 0 : index
    %48 = vector.load %arg12[%c0_30, %c0_31] : memref<2x128xf32, #tpu.memory_space<vmem>>, vector<2x128xf32>
    tpu.vector_store %arg12[%c0_30, %c0_31], %47 {strides = array<i32>} : memref<2x128xf32, #tpu.memory_space<vmem>>, vector<2x128xf32>,
    return
  }
  func.func @transform_0(%arg0: i32) -> (i32, i32) {
    %c0_i32 = arith.constant 0 : i32
    %c0_i32_0 = arith.constant 0 : i32
    return %arg0, %c0_i32 : i32, i32
  }
  func.func @transform_1(%arg0: i32) -> (i32, i32) {
    %c0_i32 = arith.constant 0 : i32
    %c0_i32_0 = arith.constant 0 : i32
    %c0_i32_1 = arith.constant 0 : i32
    return %c0_i32, %c0_i32_0 : i32, i32
  }
  func.func @transform_2(%arg0: i32) -> (i32, i32) {
    %c0_i32 = arith.constant 0 : i32
    %c0_i32_0 = arith.constant 0 : i32
    %c0_i32_1 = arith.constant 0 : i32
    return %c0_i32, %c0_i32_0 : i32, i32
  }
  func.func @transform_3(%arg0: i32) -> (i32, i32) {
    %c0_i32 = arith.constant 0 : i32
    %c0_i32_0 = arith.constant 0 : i32
    %c0_i32_1 = arith.constant 0 : i32
    return %c0_i32, %c0_i32_0 : i32, i32
  }
  func.func @transform_4(%arg0: i32) -> (i32, i32) {
    %c0_i32 = arith.constant 0 : i32
    %c0_i32_0 = arith.constant 0 : i32
    %c0_i32_1 = arith.constant 0 : i32
    return %c0_i32, %c0_i32_0 : i32, i32
  }
  func.func @transform_5(%arg0: i32) -> (i32, i32) {
    %c0_i32 = arith.constant 0 : i32
    %c0_i32_0 = arith.constant 0 : i32
    %c0_i32_1 = arith.constant 0 : i32
    return %c0_i32, %c0_i32_0 : i32, i32
  }
  func.func @transform_6(%arg0: i32) -> (i32, i32) {
    %c0_i32 = arith.constant 0 : i32
    %c0_i32_0 = arith.constant 0 : i32
    %c0_i32_1 = arith.constant 0 : i32
    return %c0_i32, %c0_i32_0 : i32, i32
  }
  func.func @transform_7(%arg0: i32) -> (i32, i32) {
    %c0_i32 = arith.constant 0 : i32
    %c0_i32_0 = arith.constant 0 : i32
    %c0_i32_1 = arith.constant 0 : i32
    return %c0_i32, %c0_i32_0 : i32, i32
  }
  func.func @transform_8(%arg0: i32) -> (i32, i32) {
    %c0_i32 = arith.constant 0 : i32
    %c0_i32_0 = arith.constant 0 : i32
    %c0_i32_1 = arith.constant 0 : i32
    return %c0_i32, %c0_i32_0 : i32, i32
  }
  func.func @transform_9(%arg0: i32) -> (i32, i32) {
    %c0_i32 = arith.constant 0 : i32
    %c0_i32_0 = arith.constant 0 : i32
    %c0_i32_1 = arith.constant 0 : i32
    return %c0_i32, %c0_i32_0 : i32, i32
  }
  func.func @transform_10(%arg0: i32) -> (i32, i32) {
    %c0_i32 = arith.constant 0 : i32
    %c0_i32_0 = arith.constant 0 : i32
    %c0_i32_1 = arith.constant 0 : i32
    return %c0_i32, %c0_i32_0 : i32, i32
  }
  func.func @transform_11(%arg0: i32) -> (i32, i32) {
    %c0_i32 = arith.constant 0 : i32
    %c0_i32_0 = arith.constant 0 : i32
    return %arg0, %c0_i32 : i32, i32
  }
}

</mosaic_0001>

<bundles_post_ra>
// kernel: tpu_custom_call.1
= control target key start
LH: loop header
LB: loop body
LE: loop exit
PB: predicated region body
PF: predicated region fallthrough
CT: control target
= control target key end

     0   :  { %vm127_vm0 = vcmask 1040384   ;;  %vm128_vm1 = vcmask 1041408   ;;  %v1689_v4 = vmov 65535   ;;  %v1690_v6 = vmov 0   ;;  %s2216_s0 = inlined_call_operand.vmem [shape: bf16[2,35], index: 0, kind: input, shape index: {}]   ;;  %s2217_s1 = inlined_call_operand.vmem [shape: bf16[35,512], index: 1, kind: input, shape index: {}]   ;;  %s2218_s2 = inlined_call_operand.vmem [shape: f32[1,512], index: 2, kind: input, shape index: {}]   ;;  %s2219_s3 = inlined_call_operand.vmem [shape: bf16[256,512], index: 3, kind: input, shape index: {}]   ;;  %s2220_s4 = inlined_call_operand.vmem [shape: f32[1,512], index: 4, kind: input, shape index: {}]   ;;  %s2221_s5 = inlined_call_operand.vmem [shape: bf16[256,64], index: 5, kind: input, shape index: {}]   ;;  %s2222_s6 = inlined_call_operand.vmem [shape: f32[1,64], index: 6, kind: input, shape index: {}]   ;;  %s2223_s7 = inlined_call_operand.vmem [shape: bf16[256,160], index: 7, kind: input, shape index: {}]   ;;  %s2224_s8 = inlined_call_operand.vmem [shape: f32[1,160], index: 8, kind: input, shape index: {}]   ;;  %s2225_s9 = inlined_call_operand.vmem [shape: bf16[160,64], index: 9, kind: input, shape index: {}]   ;;  %s2226_s10 = inlined_call_operand.vmem [shape: f32[1,64], index: 10, kind: input, shape index: {}]   ;;  %s2227_s11 = inlined_call_operand.hbm [shape: f32[2,128], index: 11, kind: output, shape index: {}]  }
   0x1   :  { %v1475_v0 = vld [vmem:[%s2217_s1 + $0x4] ss:$16 sps:$4 sm:$0xff]   ;;  %v1477_v1 = vld [vmem:[%s2217_s1 + $0xc] ss:$16 sps:$4 sm:$0xff]   ;;  %v1479_v2 = vld [vmem:[%s2217_s1] ss:$16 sps:$4 sm:$0xff]   ;;  %175 = vmatprep.mubr.bf16.mxu0 %v1690_v6  ;;  %216 = vmatprep.mubr.bf16.mxu1 %v1690_v6 }
   0x2   :  { %143 = vmatprep.subr.bf16.mxu0 %v1475_v0  ;;  %v1480_v3 = vld [vmem:[%s2217_s1 + $0x8] ss:$16 sps:$4 sm:$0xff]   ;;  %v129_v5 = vsel %vm127_vm0, 4294967295, %v1689_v4  ;;  %184 = vmatprep.subr.bf16.mxu1 %v1477_v1  ;;  %v1481_v7 = vld [vmem:[%s2217_s1 + $0x24] ss:$16 sps:$4 sm:$0xff]   ;;  %vm123_vm2 = vcmask 285696  }
   0x3   :  { %144 = vmatpush1.bf16.msra.mxu0 %v1479_v2  ;;  %185 = vmatpush1.bf16.msra.mxu1 %v1480_v3  ;;  %v1483_v8 = vld [vmem:[%s2217_s1 + $0x2c] ss:$16 sps:$4 sm:$0xff]   ;;  %v1485_v9 = vld [vmem:[%s2217_s1 + $0x20] ss:$16 sps:$4 sm:$0xff]   ;;  %v130_v10 = vsel %vm128_vm1, %v129_v5, 0 }
   0x4   :  { %145 = vmatprep.subr.bf16.mxu0 %v1481_v7  ;;  %v1486_v11 = vld [vmem:[%s2217_s1 + $0x28] ss:$16 sps:$4 sm:$0xff]   ;;  %v49_v12 = vld [vmem:[%s2217_s1 + $0x40] sm:$0x33]  ;;  %186 = vmatprep.subr.bf16.mxu1 %v1483_v8  ;;  %v1496_v23 = vld [vmem:[%s2219_s3 + $0xc] ss:$16 sps:$4 sm:$0xff]  }
   0x5   :  { %v50_v13 = vld [vmem:[%s2217_s1 + $0x48] sm:$0x33]  ;;  %v1319_v14 = vcombine.high %v49_v12, %v49_v12  ;;  %v1318_v16 = vcombine.low %v49_v12, %v49_v12  ;;  %v1493_v21 = vld [vmem:[%s2219_s3 + $0x4] ss:$16 sps:$4 sm:$0xff]   ;;  %v40_v24 = vld [vmem:[%s2216_s0] sm:$0x1] }
   0x6   :  { %v1321_v15 = vcombine.high %v50_v13, %v50_v13  ;;  %v1320_v17 = vcombine.low %v50_v13, %v50_v13  ;;  %v1491_v25 = vld [vmem:[%s2219_s3] ss:$16 sps:$4 sm:$0xff]   ;;  %v1494_v26 = vld [vmem:[%s2219_s3 + $0x8] ss:$16 sps:$4 sm:$0xff]   ;;  %v1499_v27 = vld [vmem:[%s2219_s3 + $0x24] ss:$16 sps:$4 sm:$0xff]  }
   0x7   :  { %146 = vmatpush1.bf16.msra.mxu0 %v1485_v9  ;;  %187 = vmatpush1.bf16.msra.mxu1 %v1486_v11  ;;  %v135_v18 = vand.u32 %v1319_v14, %v130_v10  ;;  %v132_v20 = vand.u32 %v1318_v16, %v130_v10  ;;  %v1502_v28 = vld [vmem:[%s2219_s3 + $0x2c] ss:$16 sps:$4 sm:$0xff]   ;;  %v1497_v29 = vld [vmem:[%s2219_s3 + $0x20] ss:$16 sps:$4 sm:$0xff]   ;;  %v1500_v30 = vld [vmem:[%s2219_s3 + $0x28] ss:$16 sps:$4 sm:$0xff]  }
   0x8   :  { %v141_v19 = vand.u32 %v1321_v15, %v130_v10  ;;  %v138_v22 = vand.u32 %v1320_v17, %v130_v10  ;;  %v1505_v31 = vld [vmem:[%s2219_s3 + $0x44] ss:$16 sps:$4 sm:$0xff]   ;;  %v1508_v32 = vld [vmem:[%s2219_s3 + $0x4c] ss:$16 sps:$4 sm:$0xff]   ;;  %v1503_v33 = vld [vmem:[%s2219_s3 + $0x40] ss:$16 sps:$4 sm:$0xff]  }
   0x9   :  { %147 = vmatprep.subr.bf16.mxu0 %v135_v18  ;;  %v1506_v34 = vld [vmem:[%s2219_s3 + $0x48] ss:$16 sps:$4 sm:$0xff]   ;;  %v1511_v35 = vld [vmem:[%s2219_s3 + $0x64] ss:$16 sps:$4 sm:$0xff]   ;;  %v1514_v36 = vld [vmem:[%s2219_s3 + $0x6c] ss:$16 sps:$4 sm:$0xff]  }
   0xa   :  { %188 = vmatprep.subr.bf16.mxu1 %v141_v19  ;;  %v1509_v37 = vld [vmem:[%s2219_s3 + $0x60] ss:$16 sps:$4 sm:$0xff]   ;;  %v1512_v38 = vld [vmem:[%s2219_s3 + $0x68] ss:$16 sps:$4 sm:$0xff]   ;;  %v1517_v39 = vld [vmem:[%s2219_s3 + $0x84] ss:$16 sps:$4 sm:$0xff]  }
   0xb   :  { %148 = vmatpush1.bf16.msra.mxu0 %v132_v20  ;;  %189 = vmatpush1.bf16.msra.mxu1 %v138_v22  ;;  %v1520_v40 = vld [vmem:[%s2219_s3 + $0x8c] ss:$16 sps:$4 sm:$0xff]   ;;  %v1515_v41 = vld [vmem:[%s2219_s3 + $0x80] ss:$16 sps:$4 sm:$0xff]   ;;  %v1518_v42 = vld [vmem:[%s2219_s3 + $0x88] ss:$16 sps:$4 sm:$0xff]  }
   0xc   :  { %639 = vmatprep.subr.bf16.mxu0 %v1493_v21  ;;  %680 = vmatprep.subr.bf16.mxu1 %v1496_v23  ;;  %v1523_v43 = vld [vmem:[%s2219_s3 + $0xa4] ss:$16 sps:$4 sm:$0xff]   ;;  %v1526_v44 = vld [vmem:[%s2219_s3 + $0xac] ss:$16 sps:$4 sm:$0xff]   ;;  %v1521_v45 = vld [vmem:[%s2219_s3 + $0xa0] ss:$16 sps:$4 sm:$0xff]  }
   0xd   :  { %v1524_v46 = vld [vmem:[%s2219_s3 + $0xa8] ss:$16 sps:$4 sm:$0xff]   ;;  %v1529_v47 = vld [vmem:[%s2219_s3 + $0xc4] ss:$16 sps:$4 sm:$0xff]   ;;  %v1532_v48 = vld [vmem:[%s2219_s3 + $0xcc] ss:$16 sps:$4 sm:$0xff]  }
   0xe   :  { %1322 = vmatmul.mubr.msk.bf16.vlgmr.msra.gmra.mrb[0].mxu0 %vm123_vm2, %v40_v24  ;;  %1323 = vmatmul.mubr.msk.bf16.vlgmr.msra.gmra.mrb[0].mxu1 %vm123_vm2, %v40_v24  ;;  %v1527_v49 = vld [vmem:[%s2219_s3 + $0xc0] ss:$16 sps:$4 sm:$0xff]   ;;  %v1530_v50 = vld [vmem:[%s2219_s3 + $0xc8] ss:$16 sps:$4 sm:$0xff]   ;;  %v1535_v51 = vld [vmem:[%s2219_s3 + $0xe4] ss:$16 sps:$4 sm:$0xff]  }
   0xf   :  { %640 = vmatpush1.bf16.msra.mxu0 %v1491_v25  ;;  %681 = vmatpush1.bf16.msra.mxu1 %v1494_v26  ;;  %v1538_v52 = vld [vmem:[%s2219_s3 + $0xec] ss:$16 sps:$4 sm:$0xff]   ;;  %v1533_v53 = vld [vmem:[%s2219_s3 + $0xe0] ss:$16 sps:$4 sm:$0xff]   ;;  %v1536_v54 = vld [vmem:[%s2219_s3 + $0xe8] ss:$16 sps:$4 sm:$0xff]  }
  0x10   :  { %641 = vmatprep.subr.bf16.mxu0 %v1499_v27  ;;  %682 = vmatprep.subr.bf16.mxu1 %v1502_v28  ;;  %v1541_v55 = vld [vmem:[%s2219_s3 + $0x104] ss:$16 sps:$4 sm:$0xff]   ;;  %v1544_v56 = vld [vmem:[%s2219_s3 + $0x10c] ss:$16 sps:$4 sm:$0xff]   ;;  %v1539_v57 = vld [vmem:[%s2219_s3 + $0x100] ss:$16 sps:$4 sm:$0xff]  }
  0x11   :  { %v1542_v58 = vld [vmem:[%s2219_s3 + $0x108] ss:$16 sps:$4 sm:$0xff]   ;;  %v1547_v59 = vld [vmem:[%s2219_s3 + $0x124] ss:$16 sps:$4 sm:$0xff]   ;;  %v1550_v60 = vld [vmem:[%s2219_s3 + $0x12c] ss:$16 sps:$4 sm:$0xff]  }
  0x12   :  { %v1545_v61 = vld [vmem:[%s2219_s3 + $0x120] ss:$16 sps:$4 sm:$0xff]   ;;  %v1548_v62 = vld [vmem:[%s2219_s3 + $0x128] ss:$16 sps:$4 sm:$0xff]   ;;  %v1553_v63 = vld [vmem:[%s2219_s3 + $0x144] ss:$16 sps:$4 sm:$0xff]  }
  0x13   :  { %642 = vmatpush1.bf16.msra.mxu0 %v1497_v29  ;;  %683 = vmatpush1.bf16.msra.mxu1 %v1500_v30  ;;  %v1556_v0 = vld [vmem:[%s2219_s3 + $0x14c] ss:$16 sps:$4 sm:$0xff]   ;;  %v1551_v1 = vld [vmem:[%s2219_s3 + $0x140] ss:$16 sps:$4 sm:$0xff]   ;;  %v1554_v2 = vld [vmem:[%s2219_s3 + $0x148] ss:$16 sps:$4 sm:$0xff]  }
  0x14   :  { %643 = vmatprep.subr.bf16.mxu0 %v1505_v31  ;;  %684 = vmatprep.subr.bf16.mxu1 %v1508_v32  ;;  %v1559_v3 = vld [vmem:[%s2219_s3 + $0x164] ss:$16 sps:$4 sm:$0xff]   ;;  %v1562_v4 = vld [vmem:[%s2219_s3 + $0x16c] ss:$16 sps:$4 sm:$0xff]   ;;  %v1557_v5 = vld [vmem:[%s2219_s3 + $0x160] ss:$16 sps:$4 sm:$0xff]  }
  0x15   :  { %v1560_v7 = vld [vmem:[%s2219_s3 + $0x168] ss:$16 sps:$4 sm:$0xff]   ;;  %v1565_v8 = vld [vmem:[%s2219_s3 + $0x184] ss:$16 sps:$4 sm:$0xff]   ;;  %v1568_v9 = vld [vmem:[%s2219_s3 + $0x18c] ss:$16 sps:$4 sm:$0xff]  }
  0x16   :  { %v1563_v10 = vld [vmem:[%s2219_s3 + $0x180] ss:$16 sps:$4 sm:$0xff]   ;;  %v1566_v11 = vld [vmem:[%s2219_s3 + $0x188] ss:$16 sps:$4 sm:$0xff]   ;;  %v1571_v12 = vld [vmem:[%s2219_s3 + $0x1a4] ss:$16 sps:$4 sm:$0xff]  }
  0x17   :  { %644 = vmatpush1.bf16.msra.mxu0 %v1503_v33  ;;  %685 = vmatpush1.bf16.msra.mxu1 %v1506_v34  ;;  %v1574_v13 = vld [vmem:[%s2219_s3 + $0x1ac] ss:$16 sps:$4 sm:$0xff]   ;;  %v1569_v14 = vld [vmem:[%s2219_s3 + $0x1a0] ss:$16 sps:$4 sm:$0xff]   ;;  %v1572_v15 = vld [vmem:[%s2219_s3 + $0x1a8] ss:$16 sps:$4 sm:$0xff]  }
  0x18   :  { %645 = vmatprep.subr.bf16.mxu0 %v1511_v35  ;;  %686 = vmatprep.subr.bf16.mxu1 %v1514_v36 }
  0x1b   :  { %646 = vmatpush1.bf16.msra.mxu0 %v1509_v37  ;;  %687 = vmatpush1.bf16.msra.mxu1 %v1512_v38 }
  0x1c   :  { %647 = vmatprep.subr.bf16.mxu0 %v1517_v39  ;;  %688 = vmatprep.subr.bf16.mxu1 %v1520_v40 }
  0x1f   :  { %648 = vmatpush1.bf16.msra.mxu0 %v1515_v41  ;;  %689 = vmatpush1.bf16.msra.mxu1 %v1518_v42 }
  0x20   :  { %649 = vmatprep.subr.bf16.mxu0 %v1523_v43  ;;  %690 = vmatprep.subr.bf16.mxu1 %v1526_v44 }
  0x23   :  { %650 = vmatpush1.bf16.msra.mxu0 %v1521_v45  ;;  %691 = vmatpush1.bf16.msra.mxu1 %v1524_v46 }
  0x24   :  { %651 = vmatprep.subr.bf16.mxu0 %v1529_v47  ;;  %692 = vmatprep.subr.bf16.mxu1 %v1532_v48 }
  0x27   :  { %652 = vmatpush1.bf16.msra.mxu0 %v1527_v49  ;;  %693 = vmatpush1.bf16.msra.mxu1 %v1530_v50 }
  0x28   :  { %653 = vmatprep.subr.bf16.mxu0 %v1535_v51  ;;  %694 = vmatprep.subr.bf16.mxu1 %v1538_v52 }
  0x2b   :  { %654 = vmatpush1.bf16.msra.mxu0 %v1533_v53  ;;  %695 = vmatpush1.bf16.msra.mxu1 %v1536_v54 }
  0x2c   :  { %655 = vmatprep.subr.bf16.mxu0 %v1541_v55  ;;  %696 = vmatprep.subr.bf16.mxu1 %v1544_v56 }
  0x2f   :  { %656 = vmatpush1.bf16.msra.mxu0 %v1539_v57  ;;  %697 = vmatpush1.bf16.msra.mxu1 %v1542_v58 }
  0x30   :  { %657 = vmatprep.subr.bf16.mxu0 %v1547_v59  ;;  %698 = vmatprep.subr.bf16.mxu1 %v1550_v60 }
  0x33   :  { %658 = vmatpush1.bf16.msra.mxu0 %v1545_v61  ;;  %699 = vmatpush1.bf16.msra.mxu1 %v1548_v62 }
  0x34   :  { %659 = vmatprep.subr.bf16.mxu0 %v1553_v63  ;;  %700 = vmatprep.subr.bf16.mxu1 %v1556_v0 }
  0x37   :  { %660 = vmatpush1.bf16.msra.mxu0 %v1551_v1  ;;  %701 = vmatpush1.bf16.msra.mxu1 %v1554_v2 }
  0x38   :  { %661 = vmatprep.subr.bf16.mxu0 %v1559_v3  ;;  %702 = vmatprep.subr.bf16.mxu1 %v1562_v4 }
  0x3b   :  { %662 = vmatpush1.bf16.msra.mxu0 %v1557_v5  ;;  %703 = vmatpush1.bf16.msra.mxu1 %v1560_v7 }
  0x3c   :  { %663 = vmatprep.subr.bf16.mxu0 %v1565_v8  ;;  %704 = vmatprep.subr.bf16.mxu1 %v1568_v9 }
  0x3f   :  { %664 = vmatpush1.bf16.msra.mxu0 %v1563_v10  ;;  %705 = vmatpush1.bf16.msra.mxu1 %v1566_v11 }
  0x40   :  { %665 = vmatprep.subr.bf16.mxu0 %v1571_v12  ;;  %706 = vmatprep.subr.bf16.mxu1 %v1574_v13 }
  0x43   :  { %666 = vmatpush1.bf16.msra.mxu0 %v1569_v14  ;;  %707 = vmatpush1.bf16.msra.mxu1 %v1572_v15 }
  0x44   :  { %16 = vsyncpa [#allocation3], 0  ;;  %v1577_v16 = vld [vmem:[%s2219_s3 + $0x1c4] ss:$16 sps:$4 sm:$0xff]   ;;  %v1580_v17 = vld [vmem:[%s2219_s3 + $0x1cc] ss:$16 sps:$4 sm:$0xff]   ;;  %v53_v26 = vlaneseq }
  0x45   :  { %v1575_v18 = vld [vmem:[%s2219_s3 + $0x1c0] ss:$16 sps:$4 sm:$0xff]   ;;  %v1578_v19 = vld [vmem:[%s2219_s3 + $0x1c8] ss:$16 sps:$4 sm:$0xff]   ;;  %667 = vmatprep.subr.bf16.mxu0 %v1577_v16  ;;  %708 = vmatprep.subr.bf16.mxu1 %v1580_v17  ;;  %v1583_v20 = vld [vmem:[%s2219_s3 + $0x1e4] ss:$16 sps:$4 sm:$0xff]  }
  0x46   :  { %v1586_v21 = vld [vmem:[%s2219_s3 + $0x1ec] ss:$16 sps:$4 sm:$0xff]   ;;  %v1581_v22 = vld [vmem:[%s2219_s3 + $0x1e0] ss:$16 sps:$4 sm:$0xff]   ;;  %v1584_v23 = vld [vmem:[%s2219_s3 + $0x1e8] ss:$16 sps:$4 sm:$0xff]  }
  0x47   :  { %668 = vmatpush1.bf16.msra.mxu0 %v1575_v18  ;;  %709 = vmatpush1.bf16.msra.mxu1 %v1578_v19  ;;  %v1589_v24 = vld [vmem:[%s2223_s7 + $0x4] ss:$8 sps:$4 sm:$0xff]   ;;  %v1987_v27 = vshrl.u32 %v53_v26, 7  ;;  %v51_v30 = vld [vmem:[%s2218_s2] sm:$0xf]  ;;  %v1621_v0 = vld [vmem:[%s2221_s5 + $0x50] sm:$0xff]  }
  0x48   :  { %669 = vmatprep.subr.bf16.mxu0 %v1583_v20  ;;  %710 = vmatprep.subr.bf16.mxu1 %v1586_v21  ;;  %v1611_v25 = vld [vmem:[%s2221_s5 + $0x40] sm:$0xff]   ;;  %v1592_v59 = vld [vmem:[%s2223_s7 + $0x14] ss:$8 sps:$4 sm:$0xff]   ;;  %v1616_v60 = vld [vmem:[%s2221_s5 + $0x48] sm:$0xff]   ;;  %vm1240_vm3 = vcmask 261120   ;;  %s1691_s3 = smov 64  }
  0x49   :  { %v1990_v28 = vsub.s32 0, %v1987_v27  ;;  %v63_v29 = vsub.s32 2, %v1987_v27  ;;  %v1997_v31 = vsub.s32 1, %v1987_v27  ;;  %v67_v32 = vsub.s32 3, %v1987_v27  ;;  %v1587_v56 = vld [vmem:[%s2223_s7] ss:$8 sps:$4 sm:$0xff]  }
  0x4a   :  { %v1615_v57 = vld [vmem:[%s2221_s5] sm:$0xff]   ;;  %v1590_v61 = vld [vmem:[%s2223_s7 + $0x10] ss:$8 sps:$4 sm:$0xff]   ;;  %v1620_v62 = vld [vmem:[%s2221_s5 + $0x8] sm:$0xff]   ;;  %s1692_s26 = smov [#allocation2]   ;;  %vm1293_vm4 = vcmask 523264  }
  0x4b   :  { %670 = vmatpush1.bf16.msra.mxu0 %v1581_v22  ;;  %711 = vmatpush1.bf16.msra.mxu1 %v1584_v23  ;;  %v56_v33 = vrot.slane %v51_v30, %v1990_v28  ;;  %v64_v34 = vrot.slane %v51_v30, %v63_v29  ;;  %v60_v35 = vrot.slane %v51_v30, %v1997_v31  ;;  %v1595_v63 = vld [vmem:[%s2223_s7 + $0x24] ss:$8 sps:$4 sm:$0xff]   ;;  %v1593_v1 = vld [vmem:[%s2223_s7 + $0x20] ss:$8 sps:$4 sm:$0xff]   ;;  %v1625_v2 = vld [vmem:[%s2221_s5 + $0x10] sm:$0xff]  }
  0x4c   :  { %1108 = vmatprep.subr.bf16.mxu1 %v1589_v24  ;;  %1449 = vmatprep.subr.bf16.mxu0 %v1611_v25  ;;  %v68_v36 = vrot.slane %v51_v30, %v67_v32  ;;  %v1598_v3 = vld [vmem:[%s2223_s7 + $0x34] ss:$8 sps:$4 sm:$0xff]   ;;  %v1596_v5 = vld [vmem:[%s2223_s7 + $0x30] ss:$8 sps:$4 sm:$0xff]   ;;  %v1601_v8 = vld [vmem:[%s2223_s7 + $0x44] ss:$8 sps:$4 sm:$0xff]  }
  0x4d   :  { %v1626_v4 = vld [vmem:[%s2221_s5 + $0x58] sm:$0xff]   ;;  %v1631_v9 = vld [vmem:[%s2221_s5 + $0x60] sm:$0xff]   ;;  %v1636_v13 = vld [vmem:[%s2221_s5 + $0x68] sm:$0xff]  }
  0x4e   :  { %v1630_v7 = vld [vmem:[%s2221_s5 + $0x18] sm:$0xff]   ;;  %v1599_v10 = vld [vmem:[%s2223_s7 + $0x40] ss:$8 sps:$4 sm:$0xff]   ;;  %v1607_v15 = vld [vmem:[%s2223_s7 + $0x64] ss:$8 sps:$4 sm:$0xff]  }
  0x4f   :  { %v1635_v11 = vld [vmem:[%s2221_s5 + $0x20] sm:$0xff]   ;;  %v1604_v12 = vld [vmem:[%s2223_s7 + $0x54] ss:$8 sps:$4 sm:$0xff]   ;;  %v1602_v14 = vld [vmem:[%s2223_s7 + $0x50] ss:$8 sps:$4 sm:$0xff]  }
  0x50   :  { %v1605_v16 = vld [vmem:[%s2223_s7 + $0x60] ss:$8 sps:$4 sm:$0xff]   ;;  %v1610_v17 = vld [vmem:[%s2223_s7 + $0x74] ss:$8 sps:$4 sm:$0xff]   ;;  %v1608_v18 = vld [vmem:[%s2223_s7 + $0x70] ss:$8 sps:$4 sm:$0xff]  }
  0x51   :  { %v1614_v19 = vld [vmem:[%s2223_s7 + $0x84] ss:$8 sps:$4 sm:$0xff]   ;;  %v1612_v20 = vld [vmem:[%s2223_s7 + $0x80] ss:$8 sps:$4 sm:$0xff]   ;;  %v1619_v21 = vld [vmem:[%s2223_s7 + $0x94] ss:$8 sps:$4 sm:$0xff]  }
  0x52   :  { %v1617_v22 = vld [vmem:[%s2223_s7 + $0x90] ss:$8 sps:$4 sm:$0xff]   ;;  %v1624_v23 = vld [vmem:[%s2223_s7 + $0xa4] ss:$8 sps:$4 sm:$0xff]   ;;  %v1622_v24 = vld [vmem:[%s2223_s7 + $0xa0] ss:$8 sps:$4 sm:$0xff]  }
  0x53   :  { %v1629_v25 = vld [vmem:[%s2223_s7 + $0xb4] ss:$8 sps:$4 sm:$0xff]   ;;  %v1627_v26 = vld [vmem:[%s2223_s7 + $0xb0] ss:$8 sps:$4 sm:$0xff]   ;;  %v1634_v30 = vld [vmem:[%s2223_s7 + $0xc4] ss:$8 sps:$4 sm:$0xff]  }
  0xe1   :  { %v177_v37 = vpop.f32.mrb[0].mxu0  ;;  %v218_v38 = vpop.f32.mrb[0].mxu1 }
  0xe2   :  { %v178_v39 = vadd.f32 %v177_v37, %v56_v33  ;;  %v219_v40 = vadd.f32 %v218_v38, %v64_v34  ;;  %v179_v41 = vpop.f32.mrb[1].mxu0  ;;  %v220_v42 = vpop.f32.mrb[1].mxu1  ;;  %v1632_v33 = vld [vmem:[%s2223_s7 + $0xc0] ss:$8 sps:$4 sm:$0xff]   ;;  %v1639_v34 = vld [vmem:[%s2223_s7 + $0xd4] ss:$8 sps:$4 sm:$0xff]  }
  0xe3   :  { %v180_v43 = vadd.f32 %v179_v41, %v60_v35  ;;  %v221_v44 = vadd.f32 %v220_v42, %v68_v36  ;;  %v181_v45 = vpop.f32.mrb[2].mxu0  ;;  %v222_v46 = vpop.f32.mrb[2].mxu1  ;;  %v1637_v35 = vld [vmem:[%s2223_s7 + $0xd0] ss:$8 sps:$4 sm:$0xff]   ;;  %v1640_v36 = vld [vmem:[%s2221_s5 + $0x28] sm:$0xff]  }
  0xe4   :  { %v225_v47 = vmax.f32 %v178_v39, 0.0  ;;  %v227_v48 = vmax.f32 %v219_v40, 0.0  ;;  %v182_v49 = vpop.f32.mrb[3].mxu0  ;;  %v223_v50 = vpop.f32.mrb[3].mxu1  ;;  %v1641_v37 = vld [vmem:[%s2221_s5 + $0x70] sm:$0xff]   ;;  %v1646_v41 = vld [vmem:[%s2221_s5 + $0x78] sm:$0xff]  }
  0xe5   :  { %v226_v51 = vmax.f32 %v180_v43, 0.0  ;;  %v228_v52 = vmax.f32 %v221_v44, 0.0  ;;  %v1644_v38 = vld [vmem:[%s2223_s7 + $0xe4] ss:$8 sps:$4 sm:$0xff]   ;;  %v1642_v39 = vld [vmem:[%s2223_s7 + $0xe0] ss:$8 sps:$4 sm:$0xff]  }
  0xe6   :  { %v229_v53 = vmax.f32 %v225_v47, %v227_v48  ;;  %v1645_v40 = vld [vmem:[%s2221_s5 + $0x30] sm:$0xff]   ;;  %v1650_v44 = vld [vmem:[%s2221_s5 + $0x38] sm:$0xff]   ;;  %v297_v45 = vld [vmem:[%s2220_s4] sm:$0xf] }
  0xe7   :  { %v230_v54 = vmax.f32 %v226_v51, %v228_v52  ;;  %v1649_v42 = vld [vmem:[%s2223_s7 + $0xf4] ss:$8 sps:$4 sm:$0xff]   ;;  %v1647_v43 = vld [vmem:[%s2223_s7 + $0xf0] ss:$8 sps:$4 sm:$0xff]   ;;  %v302_v46 = vrot.slane %v297_v45, %v1990_v28  ;;  %v310_v47 = vrot.slane %v297_v45, %v63_v29  ;;  %v306_v48 = vrot.slane %v297_v45, %v1997_v31 }
  0xe8   :  { %v231_v58 = vpack.c.bf16 %v229_v53, %v229_v53  ;;  %v314_v49 = vrot.slane %v297_v45, %v67_v32  ;;  %v1651_v32 = vld [vmem:[%s2225_s9] sm:$0xff]  }
  0xe9   :  { %v232_v55 = vpack.c.bf16 %v230_v54, %v230_v54  ;;  %v1388_v45 = vld [vmem:[%s2222_s6] ss:$0 sm:$0xff] }
  0xeb   :  { %671 = vmatprep.mubr.bf16.mxu0 %v232_v55  ;;  %712 = vmatprep.mubr.bf16.mxu1 %v232_v55 }
  0xec   :  { %672 = vmatmul.mubr.bf16.vlgmr.msra.gmra.mrb[4].mxu0 %v231_v58  ;;  %713 = vmatmul.mubr.bf16.vlgmr.msra.gmra.mrb[4].mxu1 %v231_v58 }
  0xed   :  { %1109 = vmatpush1.bf16.msra.mxu1 %v1587_v56  ;;  %1450 = vmatpush3.bf16.msra.mxu0 %v1615_v57 }
  0xee   :  { %1110 = vmatprep.subr.bf16.mxu1 %v1592_v59  ;;  %1451 = vmatprep.subr.bf16.mxu0 %v1616_v60 }
  0xf1   :  { %1111 = vmatpush1.bf16.msra.mxu1 %v1590_v61  ;;  %1452 = vmatpush3.bf16.msra.mxu0 %v1620_v62 }
  0xf2   :  { %1112 = vmatprep.subr.bf16.mxu1 %v1595_v63  ;;  %1453 = vmatprep.subr.bf16.mxu0 %v1621_v0 }
  0xf5   :  { %1113 = vmatpush1.bf16.msra.mxu1 %v1593_v1  ;;  %1454 = vmatpush3.bf16.msra.mxu0 %v1625_v2 }
  0xf6   :  { %1114 = vmatprep.subr.bf16.mxu1 %v1598_v3  ;;  %1455 = vmatprep.subr.bf16.mxu0 %v1626_v4  ;;  %v1652_v4 = vld [vmem:[%s2225_s9 + $0x8] sm:$0xff]  }
  0xf9   :  { %1115 = vmatpush1.bf16.msra.mxu1 %v1596_v5  ;;  %1456 = vmatpush3.bf16.msra.mxu0 %v1630_v7  ;;  %v1653_v5 = vld [vmem:[%s2225_s9 + $0x10] sm:$0xff]   ;;  %v1654_v7 = vld [vmem:[%s2225_s9 + $0x18] sm:$0xff]  }
  0xfa   :  { %1116 = vmatprep.subr.bf16.mxu1 %v1601_v8  ;;  %1457 = vmatprep.subr.bf16.mxu0 %v1631_v9  ;;  %v1655_v8 = vld [vmem:[%s2225_s9 + $0x20] sm:$0xff]   ;;  %v1656_v9 = vld [vmem:[%s2225_s9 + $0x28] sm:$0xff]  }
  0xfd   :  { %1117 = vmatpush1.bf16.msra.mxu1 %v1599_v10  ;;  %1458 = vmatpush3.bf16.msra.mxu0 %v1635_v11  ;;  %v1657_v10 = vld [vmem:[%s2225_s9 + $0x30] sm:$0xff]   ;;  %v1658_v11 = vld [vmem:[%s2225_s9 + $0x38] sm:$0xff]  }
  0xfe   :  { %1118 = vmatprep.subr.bf16.mxu1 %v1604_v12  ;;  %1459 = vmatprep.subr.bf16.mxu0 %v1636_v13  ;;  %v1659_v12 = vld [vmem:[%s2225_s9 + $0x40] sm:$0xff]   ;;  %v1660_v13 = vld [vmem:[%s2225_s9 + $0x48] sm:$0xff]  }
 0x101   :  { %1119 = vmatpush1.bf16.msra.mxu1 %v1602_v14  ;;  %1460 = vmatpush3.bf16.msra.mxu0 %v1640_v36  ;;  %v936_v14 = vld [vmem:[%s2224_s8] sm:$0x3] }
 0x102   :  { %1120 = vmatprep.subr.bf16.mxu1 %v1607_v15  ;;  %1461 = vmatprep.subr.bf16.mxu0 %v1641_v37  ;;  %v941_v15 = vrot.slane %v936_v14, %v1990_v28  ;;  %v1437_v28 = vld [vmem:[%s2226_s10] ss:$0 sm:$0xff]  ;;  %s1302_s10 = sshll.u32 %s1692_s26, 4  ;;  %s1303_s10 = int_to_ptr.vmem [resolvable:$true] %s1302_s10 }
 0x103   :  { %s1665_s4 = scalar_lea.vmem %s1303_s10, 32  ;;  %p1670_p1 = scmp.lt.s32.totalorder %s1303_s10, %s1303_s10 }
 0x104   :  { %p1666_p0 = scmp.ne.s32.totalorder %s1303_s10, %s1665_s4  ;;  %p1671_p2 = scmp.lt.s32.totalorder %s1665_s4, %s1665_s4 }
 0x105   :  { %1121 = vmatpush1.bf16.msra.mxu1 %v1605_v16  ;;  %1462 = vmatpush3.bf16.msra.mxu0 %v1645_v40  ;;  %v945_v16 = vrot.slane %v936_v14, %v1997_v31 }
 0x106   :  { %1122 = vmatprep.subr.bf16.mxu1 %v1610_v17  ;;  %1463 = vmatprep.subr.bf16.mxu0 %v1646_v41  ;;  %p1672_p3 = por %p1671_p2, %p1670_p1 }
 0x108   :  { %p1673_p4 = pnand %p1672_p3, %p1666_p0 }
 0x109   :  { %1123 = vmatpush1.bf16.msra.mxu1 %v1608_v18  ;;  %1464 = vmatpush3.bf16.msra.mxu0 %v1650_v44 }
 0x10a   :  { %1124 = vmatprep.subr.bf16.mxu1 %v1614_v19  ;;  %1244 = vmatprep.subr.bf16.mxu0 %v1690_v6 }
 0x10d   :  { %1125 = vmatpush1.bf16.msra.mxu1 %v1612_v20 }
 0x10e   :  { %1126 = vmatprep.subr.bf16.mxu1 %v1619_v21 }
 0x111   :  { %1127 = vmatpush1.bf16.msra.mxu1 %v1617_v22 }
 0x112   :  { %1128 = vmatprep.subr.bf16.mxu1 %v1624_v23 }
 0x115   :  { %1129 = vmatpush1.bf16.msra.mxu1 %v1622_v24 }
 0x116   :  { %1130 = vmatprep.subr.bf16.mxu1 %v1629_v25 }
 0x119   :  { %1131 = vmatpush1.bf16.msra.mxu1 %v1627_v26 }
 0x11a   :  { %1132 = vmatprep.subr.bf16.mxu1 %v1634_v30 }
 0x11d   :  { %1133 = vmatpush1.bf16.msra.mxu1 %v1632_v33 }
 0x11e   :  { %1134 = vmatprep.subr.bf16.mxu1 %v1639_v34 }
 0x121   :  { %1135 = vmatpush1.bf16.msra.mxu1 %v1637_v35 }
 0x122   :  { %1136 = vmatprep.subr.bf16.mxu1 %v1644_v38 }
 0x125   :  { %1137 = vmatpush1.bf16.msra.mxu1 %v1642_v39 }
 0x126   :  { %1138 = vmatprep.subr.bf16.mxu1 %v1649_v42 }
 0x129   :  { %1139 = vmatpush1.bf16.msra.mxu1 %v1647_v43 }
 0x1bf   :  { %v673_v50 = vpop.f32.mrb[4].mxu0  ;;  %v714_v51 = vpop.f32.mrb[4].mxu1 }
 0x1c0   :  { %v674_v52 = vadd.f32 %v673_v50, %v302_v46  ;;  %v715_v53 = vadd.f32 %v714_v51, %v310_v47  ;;  %v675_v54 = vpop.f32.mrb[5].mxu0  ;;  %v716_v55 = vpop.f32.mrb[5].mxu1 }
 0x1c1   :  { %v676_v56 = vadd.f32 %v675_v54, %v306_v48  ;;  %v717_v57 = vadd.f32 %v716_v55, %v314_v49  ;;  %v677_v58 = vpop.f32.mrb[6].mxu0  ;;  %v718_v59 = vpop.f32.mrb[6].mxu1 }
 0x1c2   :  { %v721_v60 = vmax.f32 %v674_v52, 0.0  ;;  %v723_v61 = vmax.f32 %v715_v53, 0.0  ;;  %v678_v62 = vpop.f32.mrb[7].mxu0  ;;  %v719_v63 = vpop.f32.mrb[7].mxu1 }
 0x1c3   :  { %v722_v29 = vmax.f32 %v676_v56, 0.0  ;;  %v724_v0 = vmax.f32 %v717_v57, 0.0 }
 0x1c4   :  { %v725_v1 = vmax.f32 %v721_v60, %v723_v61 }
 0x1c5   :  { %v726_v2 = vmax.f32 %v722_v29, %v724_v0 }
 0x1c6   :  { %v727_v3 = vpack.c.bf16 %v725_v1, %v725_v1 }
 0x1c7   :  { %v728_v27 = vpack.c.bf16 %v726_v2, %v726_v2 }
 0x1c9   :  { %896 = vmatprep.mubr.bf16.mxu0 %v728_v27  ;;  %1140 = vmatprep.mubr.bf16.mxu1 %v728_v27 }
 0x1ca   :  { %897 = vmatmul.mubr.bf16.vlgmr.msra.gmra.mrb[8].mxu0 %v727_v3  ;;  %1141 = vmatmul.mubr.bf16.vlgmr.msra.gmra.mrb[8].mxu1 %v727_v3 }
 0x1cb   :  { %1245 = vmatpush1.bf16.msra.mxu0 %v1651_v32 }
 0x1cc   :  { %1246 = vmatprep.subr.bf16.mxu0 %v1690_v6 }
 0x1cf   :  { %1247 = vmatpush1.bf16.msra.mxu0 %v1652_v4 }
 0x1d0   :  { %1248 = vmatprep.subr.bf16.mxu0 %v1690_v6 }
 0x1d3   :  { %1249 = vmatpush1.bf16.msra.mxu0 %v1653_v5 }
 0x1d4   :  { %1250 = vmatprep.subr.bf16.mxu0 %v1690_v6 }
 0x1d7   :  { %1251 = vmatpush1.bf16.msra.mxu0 %v1654_v7 }
 0x1d8   :  { %1252 = vmatprep.subr.bf16.mxu0 %v1690_v6 }
 0x1db   :  { %1253 = vmatpush1.bf16.msra.mxu0 %v1655_v8 }
 0x1dc   :  { %1254 = vmatprep.subr.bf16.mxu0 %v1690_v6 }
 0x1df   :  { %1255 = vmatpush1.bf16.msra.mxu0 %v1656_v9 }
 0x1e0   :  { %1256 = vmatprep.subr.bf16.mxu0 %v1690_v6 }
 0x1e3   :  { %1257 = vmatpush1.bf16.msra.mxu0 %v1657_v10 }
 0x1e4   :  { %1258 = vmatprep.subr.bf16.mxu0 %v1690_v6 }
 0x1e7   :  { %1259 = vmatpush1.bf16.msra.mxu0 %v1658_v11 }
 0x1e8   :  { %1260 = vmatprep.subr.bf16.mxu0 %v1690_v6 }
 0x1eb   :  { %1261 = vmatpush1.bf16.msra.mxu0 %v1659_v12 }
 0x1ec   :  { %1262 = vmatprep.subr.bf16.mxu0 %v1690_v6 }
 0x1ef   :  { %1263 = vmatpush1.bf16.msra.mxu0 %v1660_v13 }
 0x29d   :  { %v1465_v17 = vpop.f32.mrb[8].mxu0  ;;  %v1142_v18 = vpop.f32.mrb[8].mxu1 }
 0x29e   :  { %v1143_v19 = vadd.f32 %v1142_v18, %v941_v15  ;;  %v1466_v20 = vpop.f32.mrb[9].mxu0  ;;  %v1144_v21 = vpop.f32.mrb[9].mxu1 }
 0x29f   :  { %v1467_v22 = vadd.f32 %v1466_v20, %v1465_v17  ;;  %v1145_v6 = vadd.f32 %v1144_v21, %v945_v16  ;;  %v1468_v23 = vpop.f32.mrb[10].mxu0  ;;  %v1146_v24 = vpop.f32.mrb[10].mxu1 }
 0x2a0   :  { %v1149_v25 = vmax.f32 %v1143_v19, 0.0  ;;  %v1469_v26 = vpop.f32.mrb[11].mxu0  ;;  %v1147_v30 = vpop.f32.mrb[11].mxu1 }
 0x2a1   :  { %v1150_v33 = vmax.f32 %v1145_v6, 0.0  ;;  %v899_v46 = vadd.f32 %v1467_v22, %v1388_v45 }
 0x2a2   :  { %v1151_v35 = vpack.c.bf16 %v1149_v25, %v1149_v25 }
 0x2a3   :  { %v1152_v34 = vpack.c.bf16 %v1150_v33, %v1150_v33 }
 0x2a5   :  { %1448 = vmatprep.mubr.msk.bf16.mxu0 %vm1240_vm3, %v1152_v34 }
 0x2a6   :  { %1277 = vmatmul.mubr.bf16.vlgmr.msra.gmra.mrb[12].mxu0 %v1151_v35 }
 0x379   :  { %v1278_v31 = vpop.f32.mrb[12].mxu0 }
 0x37a   :  { %v1279_v36 = vadd.f32 %v1437_v28, %v1278_v31  ;;  %v1280_v37 = vpop.f32.mrb[13].mxu0 }
 0x37b   :  { %v1281_v38 = vpop.f32.mrb[14].mxu0 }
 0x37c   :  { %v1284_v39 = vsub.f32 0.0, %v1279_v36  ;;  %v1282_v40 = vpop.f32.mrb[15].mxu0 }
 0x37e   :  { %v1285_v41 = vmul.f32 1.442695, %v1284_v39 }
 0x380   :  { %1661 = vpow2.f32 %v1285_v41 }
 0x38a   :  { %v1662_v42 = vpop.eup %1661 }
 0x38b   :  { %v1287_v43 = vadd.f32 1.0, %v1662_v42 }
 0x38d   :  { %1663 = vrcp.f32 %v1287_v43 }
 0x397   :  { %v1664_v44 = vpop.eup %1663 }
 0x398   :  { %1290 = vrot.lane.b32.xlu0 %v1664_v44, %s1691_s3 }
 0x40a   :  { %v1291_v47 = vpop.permute.xlu0 %1290 }
 0x40b   :  { %v1294_v48 = vsel %vm1293_vm4, %v899_v46, %v1291_v47 }
 0x40c   :  { %1295 = vst [vmem:[#allocation2] sm:$0x3] %v1294_v48 }
 0x40d   :  { %1676 = shalt.err (!%p1673_p4)
}
 0x40e   :  { %s1677_s27 = scalar_lea.hbm %s2227_s11, 32 }
 0x40f   :  { %p1678_p5 = scmp.ne.s32.totalorder %s2227_s11, %s1677_s27  ;;  %p1681_p6 = scmp.lt.u32.totalorder %s1677_s27, %s2227_s11 }
 0x411   :  { %p1683_p7 = pnand %p1681_p6, %p1678_p5 }
 0x413   :  { %1686 = shalt.err (!%p1683_p7)
}
 0x414   :  { %1305 = dma.vmem_to_hbm [thread:$0]  %s1303_s10, 32, %s2227_s11, [#allocation3]  }
 0x415   :  { %1687 = dma.done.wait [#allocation3], 32  }
 0x416   :  { %1688 = vsyncadd [#allocation3], 4294967264 }
 0x417   :  { %1309 = vsyncpa [#allocation3], 1 }

</bundles_post_ra>
